<compile_context>
chip_gen: v7x
topology: tpu7x:2x2x1
jax: 0.10.0
libtpu: 0.0.40
codegen_flags: <defaults>
</compile_context>

<pallas_src>
import functools

import jax
import jax.numpy as jnp
from jax.experimental import pallas as pl
from jax.experimental.pallas import tpu as pltpu


def _round_up(x, m):
    return (x + m - 1) // m * m


def _mish(x):
    # mish(x) = x * tanh(softplus(x)) = x * (e^2x + 2 e^x) / (e^2x + 2 e^x + 2)
    # 1 exp (EUP) + 1 approx reciprocal (EUP, nearly-free slot) + a few VALU ops.
    ex = jnp.exp(jnp.minimum(x, 20.0))            # e^20 squared stays < f32 max
    num = ex * ex + 2.0 * ex
    y = x * num * pl.reciprocal(num + 2.0, approx=True)
    return jnp.where(x > 20.0, x, y)              # tanh(softplus(x)) == 1 for x > 20


def _linear_net_kernel(x_ref, w_ref, b_ref, out_ref, *, dp):
    # x_ref:  (TB, Dp)        f32   activations (batch tile)
    # w_ref:  (Dp+256, 128)   bf16  packed [w1 | w2_pad | w3_pad] slab
    # b_ref:  (8, 128)        f32   rows 0/1/2 = b1 / b2_pad / b3_pad
    # out_ref:(TB, 128)       f32   lane-dense output (cols >= action_dim are 0)
    x = x_ref[...].astype(jnp.bfloat16)
    b = b_ref[...]

    # linear1 + mish (+ dropout1 == identity in eval mode)
    w1 = w_ref[pl.ds(0, dp), :]                                  # (Dp, 128)
    h = jnp.dot(x, w1, preferred_element_type=jnp.float32)
    h = _mish(h + b[0:1, :])

    # linear2 + mish (+ dropout2 == identity in eval mode)
    w2 = w_ref[pl.ds(dp, 128), :]                                # (128, 128)
    h = jnp.dot(h.astype(jnp.bfloat16), w2, preferred_element_type=jnp.float32)
    h = _mish(h + b[1:2, :])                                     # padded cols stay exactly 0

    # linear3
    w3 = w_ref[pl.ds(dp + 128, 128), :]                          # (128, 128)
    h = jnp.dot(h.astype(jnp.bfloat16), w3, preferred_element_type=jnp.float32)
    out_ref[...] = (h + b[2:3, :]).astype(out_ref.dtype)


def init_linear_net_params(key, global_cond_dim, action_dim):
    """PyTorch-style uniform(+-1/sqrt(fan_in)) init; weights stored (in, out)."""
    def linear(k, fan_in, fan_out):
        kw, kb = jax.random.split(k)
        bound = 1.0 / (fan_in ** 0.5)
        w = jax.random.uniform(kw, (fan_in, fan_out), jnp.float32, -bound, bound)
        b = jax.random.uniform(kb, (1, fan_out), jnp.float32, -bound, bound)
        return w, b

    k1, k2, k3 = jax.random.split(key, 3)
    w1, b1 = linear(k1, global_cond_dim, 128)
    w2, b2 = linear(k2, 128, 64)
    w3, b3 = linear(k3, 64, action_dim)
    return (w1, b1, w2, b2, w3, b3)


def pack_linear_net_params(params):
    """Pack weights into one bf16 slab (128-lane padded, 16-row aligned) and
    biases into one (8,128) f32 block. Done once, outside the per-call path."""
    w1, b1, w2, b2, w3, b3 = params
    dg, h1 = w1.shape
    h2 = w2.shape[1]
    ad = w3.shape[1]
    # TODO(synk): generalize packing for hidden/action dims > 128.
    assert h1 == 128 and w2.shape[0] == 128 and h2 <= 128
    assert w3.shape[0] == h2 and ad <= 128

    dp = _round_up(dg, 16)   # 16-row alignment for bf16 sublane packing
    w1p = jnp.zeros((dp, 128), jnp.float32).at[:dg, :].set(w1)
    w2p = jnp.zeros((128, 128), jnp.float32).at[:, :h2].set(w2)
    w3p = jnp.zeros((128, 128), jnp.float32).at[:h2, :ad].set(w3)
    wslab = jnp.concatenate([w1p, w2p, w3p], axis=0).astype(jnp.bfloat16)

    bslab = jnp.zeros((8, 128), jnp.float32)
    bslab = bslab.at[0, :].set(b1.reshape(-1))
    bslab = bslab.at[1, :h2].set(b2.reshape(-1))
    bslab = bslab.at[2, :ad].set(b3.reshape(-1))
    return wslab, bslab, int(dg), int(ad)


def linear_net_forward(global_cond, packed, *, block_b=512):
    """global_cond: (B, global_cond_dim) float. Returns (B, action_dim) f32."""
    wslab, bslab, dg, action_dim = packed
    dp = wslab.shape[0] - 256

    assert global_cond.ndim == 2 and global_cond.shape[1] == dg
    x = global_cond.astype(jnp.float32)
    B = x.shape[0]
    if dg != dp:                              # pad feature dim to the slab's K
        x = jnp.pad(x, ((0, 0), (0, dp - dg)))

    bp = _round_up(max(B, 1), 8)              # f32 sublane multiple
    tb = min(block_b, bp)                     # batch tile (multiple of 8)
    bp = _round_up(bp, tb)
    if bp != B:
        x = jnp.pad(x, ((0, bp - B), (0, 0)))

    out = pl.pallas_call(
        functools.partial(_linear_net_kernel, dp=dp),
        out_shape=jax.ShapeDtypeStruct((bp, 128), jnp.float32),
        grid=(bp // tb,),
        in_specs=[
            pl.BlockSpec((tb, dp), lambda i: (i, 0)),        # x: batch-tiled
            pl.BlockSpec(wslab.shape, lambda i: (0, 0)),     # weights: resident
            pl.BlockSpec(bslab.shape, lambda i: (0, 0)),     # biases: resident
        ],
        out_specs=pl.BlockSpec((tb, 128), lambda i: (i, 0)),  # lane-dense out
        compiler_params=pltpu.CompilerParams(
            dimension_semantics=("parallel",)),
    )(x, wslab, bslab)

    return out[:B, :action_dim]


if __name__ == "__main__":
    B = 8
    global_cond_dim = 32
    action_dim = 8

    key = jax.random.PRNGKey(0)
    k_params, k_x, k_x2 = jax.random.split(key, 3)

    params = init_linear_net_params(k_params, global_cond_dim, action_dim)
    packed = pack_linear_net_params(params)

    def reference(x, p):
        w1, b1, w2, b2, w3, b3 = p
        mish = lambda v: v * jnp.tanh(jax.nn.softplus(v))
        h = mish(x @ w1 + b1)
        h = mish(h @ w2 + b2)
        return h @ w3 + b3

    # Small batch (single grid step).
    x_small = jax.random.normal(k_x, (B, global_cond_dim), jnp.float32)
    out = linear_net_forward(x_small, packed)
    jax.block_until_ready(out)
    ref = reference(x_small, params)
    assert out.shape == (B, action_dim)
    assert jnp.allclose(out, ref, atol=2e-2, rtol=2e-2)

    # Non-multiple batch with a multi-step tiled grid (exercises padding path).
    x_big = jax.random.normal(k_x2, (300, global_cond_dim), jnp.float32)
    out_big = linear_net_forward(x_big, packed, block_b=128)
    jax.block_until_ready(out_big)
    ref_big = reference(x_big, params)
    assert out_big.shape == (300, action_dim)
    assert jnp.allclose(out_big, ref_big, atol=2e-2, rtol=2e-2)

    print("KERNEL_OK")
</pallas_src>

<mosaic_0001>
module attributes {stable_mosaic.version = 11 : i64} {
  func.func @_linear_net_kernel(%arg0: i32, %arg1: memref<8x32xf32, #tpu.memory_space<vmem>>, %arg2: memref<288x128xbf16, #tpu.memory_space<vmem>>, %arg3: memref<8x128xf32, #tpu.memory_space<vmem>>, %arg4: memref<8x128xf32, #tpu.memory_space<vmem>>) attributes {dimension_semantics = [#tpu.dimension_semantics<parallel>], iteration_bounds = array<i64: 1>, scalar_prefetch = 0 : i64, scratch_operands = 0 : i64, tpu.core_type = #tpu.core_type<tc>, window_params = [{transform_indices = @transform_0, window_bounds = array<i64: 8, 32>}, {pipeline_mode = #tpu.pipeline_mode<synchronous>, transform_indices = @transform_1, window_bounds = array<i64: 288, 128>}, {pipeline_mode = #tpu.pipeline_mode<synchronous>, transform_indices = @transform_2, window_bounds = array<i64: 8, 128>}, {transform_indices = @transform_3, window_bounds = array<i64: 8, 128>}]} {
    %c0 = arith.constant 0 : index
    %c0_0 = arith.constant 0 : index
    %0 = vector.load %arg1[%c0, %c0_0] : memref<8x32xf32, #tpu.memory_space<vmem>>, vector<8x32xf32>
    %1 = arith.truncf %0 : vector<8x32xf32> to vector<8x32xbf16>
    %c0_1 = arith.constant 0 : index
    %c0_2 = arith.constant 0 : index
    %2 = vector.load %arg3[%c0_1, %c0_2] : memref<8x128xf32, #tpu.memory_space<vmem>>, vector<8x128xf32>
    %c0_3 = arith.constant 0 : index
    %c0_4 = arith.constant 0 : index
    %3 = vector.load %arg2[%c0_3, %c0_4] : memref<288x128xbf16, #tpu.memory_space<vmem>>, vector<32x128xbf16>
    %cst = arith.constant dense<0.000000e+00> : vector<8x128xf32>
    %4 = tpu.matmul %1, %3, %cst {dimension_numbers = #tpu.dot_dimension_numbers<[1], [0], [0], [1], [0, 0, 1, 1], [], []>} : vector<8x32xbf16>, vector<32x128xbf16>, vector<8x128xf32> -> vector<8x128xf32>
    %5 = vector.extract_strided_slice %2 {offsets = [0, 0], sizes = [1, 128], strides = [1, 1]} : vector<8x128xf32> to vector<1x128xf32>
    %6 = vector.broadcast %5 : vector<1x128xf32> to vector<8x128xf32>
    %7 = arith.addf %4, %6 : vector<8x128xf32>
    %cst_5 = arith.constant 2.000000e+01 : f32
    %8 = vector.broadcast %cst_5 : f32 to vector<8x128xf32>
    %9 = arith.minimumf %7, %8 : vector<8x128xf32>
    %10 = math.exp %9 : vector<8x128xf32>
    %11 = arith.mulf %10, %10 : vector<8x128xf32>
    %cst_6 = arith.constant 2.000000e+00 : f32
    %12 = vector.broadcast %cst_6 : f32 to vector<8x128xf32>
    %13 = arith.mulf %12, %10 : vector<8x128xf32>
    %14 = arith.addf %11, %13 : vector<8x128xf32>
    %15 = arith.mulf %7, %14 : vector<8x128xf32>
    %cst_7 = arith.constant 2.000000e+00 : f32
    %16 = vector.broadcast %cst_7 : f32 to vector<8x128xf32>
    %17 = arith.addf %14, %16 : vector<8x128xf32>
    %18 = tpu.reciprocal %17 {approx = true} : vector<8x128xf32> -> vector<8x128xf32>
    %19 = arith.mulf %15, %18 : vector<8x128xf32>
    %cst_8 = arith.constant 2.000000e+01 : f32
    %20 = vector.broadcast %cst_8 : f32 to vector<8x128xf32>
    %21 = arith.cmpf ogt, %7, %20 : vector<8x128xf32>
    %22 = arith.select %21, %7, %19 : vector<8x128xi1>, vector<8x128xf32>
    %c32 = arith.constant 32 : index
    %c0_9 = arith.constant 0 : index
    %23 = vector.load %arg2[%c32, %c0_9] : memref<288x128xbf16, #tpu.memory_space<vmem>>, vector<128x128xbf16>
    %24 = arith.truncf %22 : vector<8x128xf32> to vector<8x128xbf16>
    %cst_10 = arith.constant dense<0.000000e+00> : vector<8x128xf32>
    %25 = tpu.matmul %24, %23, %cst_10 {dimension_numbers = #tpu.dot_dimension_numbers<[1], [0], [0], [1], [0, 0, 1, 1], [], []>} : vector<8x128xbf16>, vector<128x128xbf16>, vector<8x128xf32> -> vector<8x128xf32>
    %26 = vector.extract_strided_slice %2 {offsets = [1, 0], sizes = [1, 128], strides = [1, 1]} : vector<8x128xf32> to vector<1x128xf32>
    %27 = vector.broadcast %26 : vector<1x128xf32> to vector<8x128xf32>
    %28 = arith.addf %25, %27 : vector<8x128xf32>
    %cst_11 = arith.constant 2.000000e+01 : f32
    %29 = vector.broadcast %cst_11 : f32 to vector<8x128xf32>
    %30 = arith.minimumf %28, %29 : vector<8x128xf32>
    %31 = math.exp %30 : vector<8x128xf32>
    %32 = arith.mulf %31, %31 : vector<8x128xf32>
    %cst_12 = arith.constant 2.000000e+00 : f32
    %33 = vector.broadcast %cst_12 : f32 to vector<8x128xf32>
    %34 = arith.mulf %33, %31 : vector<8x128xf32>
    %35 = arith.addf %32, %34 : vector<8x128xf32>
    %36 = arith.mulf %28, %35 : vector<8x128xf32>
    %cst_13 = arith.constant 2.000000e+00 : f32
    %37 = vector.broadcast %cst_13 : f32 to vector<8x128xf32>
    %38 = arith.addf %35, %37 : vector<8x128xf32>
    %39 = tpu.reciprocal %38 {approx = true} : vector<8x128xf32> -> vector<8x128xf32>
    %40 = arith.mulf %36, %39 : vector<8x128xf32>
    %cst_14 = arith.constant 2.000000e+01 : f32
    %41 = vector.broadcast %cst_14 : f32 to vector<8x128xf32>
    %42 = arith.cmpf ogt, %28, %41 : vector<8x128xf32>
    %43 = arith.select %42, %28, %40 : vector<8x128xi1>, vector<8x128xf32>
    %c160 = arith.constant 160 : index
    %c0_15 = arith.constant 0 : index
    %44 = vector.load %arg2[%c160, %c0_15] : memref<288x128xbf16, #tpu.memory_space<vmem>>, vector<128x128xbf16>
    %45 = arith.truncf %43 : vector<8x128xf32> to vector<8x128xbf16>
    %cst_16 = arith.constant dense<0.000000e+00> : vector<8x128xf32>
    %46 = tpu.matmul %45, %44, %cst_16 {dimension_numbers = #tpu.dot_dimension_numbers<[1], [0], [0], [1], [0, 0, 1, 1], [], []>} : vector<8x128xbf16>, vector<128x128xbf16>, vector<8x128xf32> -> vector<8x128xf32>
    %47 = vector.extract_strided_slice %2 {offsets = [2, 0], sizes = [1, 128], strides = [1, 1]} : vector<8x128xf32> to vector<1x128xf32>
    %48 = vector.broadcast %47 : vector<1x128xf32> to vector<8x128xf32>
    %49 = arith.addf %46, %48 : vector<8x128xf32>
    %c0_17 = arith.constant 0 : index
    %c0_18 = arith.constant 0 : index
    %50 = vector.load %arg4[%c0_17, %c0_18] : memref<8x128xf32, #tpu.memory_space<vmem>>, vector<8x128xf32>
    tpu.vector_store %arg4[%c0_17, %c0_18], %49 {strides = array<i32>} : memref<8x128xf32, #tpu.memory_space<vmem>>, vector<8x128xf32>,
    return
  }
  func.func @transform_0(%arg0: i32) -> (i32, i32) {
    %c0_i32 = arith.constant 0 : i32
    %c0_i32_0 = arith.constant 0 : i32
    return %arg0, %c0_i32 : i32, i32
  }
  func.func @transform_1(%arg0: i32) -> (i32, i32) {
    %c0_i32 = arith.constant 0 : i32
    %c0_i32_0 = arith.constant 0 : i32
    %c0_i32_1 = arith.constant 0 : i32
    return %c0_i32, %c0_i32_0 : i32, i32
  }
  func.func @transform_2(%arg0: i32) -> (i32, i32) {
    %c0_i32 = arith.constant 0 : i32
    %c0_i32_0 = arith.constant 0 : i32
    %c0_i32_1 = arith.constant 0 : i32
    return %c0_i32, %c0_i32_0 : i32, i32
  }
  func.func @transform_3(%arg0: i32) -> (i32, i32) {
    %c0_i32 = arith.constant 0 : i32
    %c0_i32_0 = arith.constant 0 : i32
    return %arg0, %c0_i32 : i32, i32
  }
}

</mosaic_0001>

<bundles_post_ra>
// kernel: tpu_custom_call.1
= control target key start
LH: loop header
LB: loop body
LE: loop exit
PB: predicated region body
PF: predicated region fallthrough
CT: control target
= control target key end

     0   :  { %8 = vsyncpa [#allocation3], 0  ;;  %s702_s0 = inlined_call_operand.hbm [shape: f32[8,32], index: 0, kind: input, shape index: {}]   ;;  %s703_s1 = inlined_call_operand.hbm [shape: bf16[288,128], index: 1, kind: input, shape index: {}]   ;;  %s704_s2 = inlined_call_operand.hbm [shape: f32[8,128], index: 2, kind: input, shape index: {}]   ;;  %s705_s3 = inlined_call_operand.hbm [shape: f32[8,128], index: 3, kind: output, shape index: {}]  }
   0x1   :  { %9 = vsyncpa [#allocation6], 0 }
   0x2   :  { %10 = vsyncpa [#allocation4], 0  ;;  %s595_s12 = smov [#allocation5]   ;;  %s501_s16 = scalar_lea.hbm %s703_s1, 2304 }
   0x3   :  { %s26_s13 = sshll.u32 %s595_s12, 4  ;;  %p502_p0 = scmp.ne.s32.totalorder %s703_s1, %s501_s16  ;;  %s27_s13 = int_to_ptr.vmem [resolvable:$true] %s26_s13 }
   0x4   :  { %p505_p1 = scmp.lt.u32.totalorder %s501_s16, %s703_s1 }
   0x6   :  { %p507_p2 = pnand %p505_p1, %p502_p0 }
   0x8   :  { %510 = shalt.err (!%p507_p2)
}
   0x9   :  { %s511_s21 = scalar_lea.vmem %s27_s13, 2304  ;;  %p516_p4 = scmp.lt.s32.totalorder %s27_s13, %s27_s13 }
   0xa   :  { %p512_p3 = scmp.ne.s32.totalorder %s27_s13, %s511_s21  ;;  %p517_p5 = scmp.lt.s32.totalorder %s511_s21, %s511_s21 }
   0xc   :  { %p518_p6 = por %p517_p5, %p516_p4 }
   0xe   :  { %p519_p7 = pnand %p518_p6, %p512_p3 }
  0x10   :  { %522 = shalt.err (!%p519_p7)
}
  0x11   :  { %s596_s22 = smov 64   ;;  %s597_s23 = smov 4  }
  0x12   :  { %32 = dma.hbm_to_vmem [thread:$0]  %s703_s1, 2304, %s27_s13, [#allocation6], %s596_s22, %s596_s22, %s597_s23  }
  0x13   :  { %s598_s26 = smov [#allocation2]   ;;  %s599_s28 = smov [#allocation7]  }
  0x14   :  { %s17_s27 = sshll.u32 %s598_s26, 4  ;;  %s39_s29 = sshll.u32 %s599_s28, 4  ;;  %s18_s27 = int_to_ptr.vmem [resolvable:$true] %s17_s27  ;;  %s40_s29 = int_to_ptr.vmem [resolvable:$true] %s39_s29 }
  0x15   :  { %s523_s5 = scalar_lea.hbm %s702_s0, 128 }
  0x16   :  { %p524_p8 = scmp.ne.s32.totalorder %s702_s0, %s523_s5  ;;  %p527_p9 = scmp.lt.u32.totalorder %s523_s5, %s702_s0 }
  0x18   :  { %p529_p10 = pnand %p527_p9, %p524_p8 }
  0x1a   :  { %532 = shalt.err (!%p529_p10)
}
  0x1b   :  { %s533_s1 = scalar_lea.vmem %s18_s27, 128  ;;  %p538_p12 = scmp.lt.s32.totalorder %s18_s27, %s18_s27 }
  0x1c   :  { %p534_p11 = scmp.ne.s32.totalorder %s18_s27, %s533_s1  ;;  %p539_p13 = scmp.lt.s32.totalorder %s533_s1, %s533_s1 }
  0x1e   :  { %p540_p0 = por %p539_p13, %p538_p12 }
  0x20   :  { %p541_p1 = pnand %p540_p0, %p534_p11 }
  0x22   :  { %544 = shalt.err (!%p541_p1)
}
  0x23   :  { %20 = dma.hbm_to_vmem [thread:$0]  %s702_s0, 128, %s18_s27, [#allocation3]  }
  0x24   :  { %s545_s14 = scalar_lea.hbm %s704_s2, 128 }
  0x25   :  { %p546_p2 = scmp.ne.s32.totalorder %s704_s2, %s545_s14  ;;  %p549_p3 = scmp.lt.u32.totalorder %s545_s14, %s704_s2 }
  0x27   :  { %p551_p4 = pnand %p549_p3, %p546_p2 }
  0x29   :  { %554 = shalt.err (!%p551_p4)
}
  0x2a   :  { %s555_s19 = scalar_lea.vmem %s40_s29, 128  ;;  %p560_p6 = scmp.lt.s32.totalorder %s40_s29, %s40_s29 }
  0x2b   :  { %p556_p5 = scmp.ne.s32.totalorder %s40_s29, %s555_s19  ;;  %p561_p7 = scmp.lt.s32.totalorder %s555_s19, %s555_s19 }
  0x2d   :  { %p562_p8 = por %p561_p7, %p560_p6 }
  0x2f   :  { %p563_p9 = pnand %p562_p8, %p556_p5 }
  0x31   :  { %566 = shalt.err (!%p563_p9)
}
  0x32   :  { %42 = dma.hbm_to_vmem [thread:$0]  %s704_s2, 128, %s40_s29, [#allocation6]  }
  0x33   :  { %589 = dma.done.wait [#allocation3], 128  }
  0x34   :  { %590 = vsyncadd [#allocation3], 4294967168 }
  0x35   :  { %591 = dma.done.wait [#allocation6], 2432  }
  0x36   :  { %592 = vsyncadd [#allocation6], 4294964864  ;;  %v600_v0 = vmov 0.0   ;;  %vm601_vm0 = vmmov 0   ;;  %v475_v1 = vld [vmem:[#allocation5] sm:$0xff]   ;;  %v476_v2 = vld [vmem:[#allocation5 + $0x8] sm:$0xff]   ;;  %v60_v13 = vlaneseq }
  0x37   :  { %419 = vmatprep.subr.bf16.mxu0 %v600_v0  ;;  %423 = vmatprep.mubr.msk.bf16.mxu0 %vm601_vm0, %v600_v0  ;;  %v53_v3 = vld [vmem:[#allocation2] sm:$0xff]  ;;  %vm76_vm1 = vcmask 261120   ;;  %v477_v5 = vld [vmem:[#allocation5 + $0x10] sm:$0xff]   ;;  %v479_v7 = vld [vmem:[#allocation5 + $0x20] sm:$0xff]   ;;  %s602_s2 = smov [#allocation8]  }
  0x38   :  { %427 = vmatprep.subr.bf16.mxu1 %v600_v0  ;;  %443 = vmatprep.mubr.msk.bf16.mxu1 %vm601_vm0, %v600_v0  ;;  %v54_v4 = vpack.c.bf16 %v53_v3, %v53_v3  ;;  %v478_v6 = vld [vmem:[#allocation5 + $0x18] sm:$0xff]   ;;  %v480_v8 = vld [vmem:[#allocation5 + $0x28] sm:$0xff]   ;;  %v481_v9 = vld [vmem:[#allocation5 + $0x30] sm:$0xff]   ;;  %v673_v14 = vshrl.u32 %v60_v13, 7  ;;  %s369_s21 = sshll.u32 %s602_s2, 4  ;;  %s370_s21 = int_to_ptr.vmem [resolvable:$true] %s369_s21 }
  0x39   :  { %420 = vmatpush3.bf16.msra.mxu0 %v475_v1  ;;  %428 = vmatpush3.bf16.msra.mxu1 %v477_v5  ;;  %v482_v10 = vld [vmem:[#allocation5 + $0x38] sm:$0xff]   ;;  %v483_v11 = vld [vmem:[#allocation5 + $0x40] sm:$0xff]   ;;  %v484_v12 = vld [vmem:[#allocation5 + $0x48] sm:$0xff]   ;;  %s567_s22 = scalar_lea.vmem %s370_s21, 128  ;;  %p572_p11 = scmp.lt.s32.totalorder %s370_s21, %s370_s21 }
  0x3a   :  { %421 = vmatprep.subr.bf16.mxu0 %v600_v0  ;;  %429 = vmatprep.subr.bf16.mxu1 %v600_v0  ;;  %v62_v15 = vsub.s32 0, %v673_v14  ;;  %v676_v16 = vld [vmem:[#allocation7] sm:$0xff]  ;;  %v486_v36 = vld [vmem:[#allocation5 + $0x58] sm:$0xff]   ;;  %v487_v37 = vld [vmem:[#allocation5 + $0x60] sm:$0xff]   ;;  %v151_v43 = vsub.s32 1, %v673_v14  ;;  %v272_v62 = vsub.s32 2, %v673_v14  ;;  %p568_p10 = scmp.ne.s32.totalorder %s370_s21, %s567_s22  ;;  %p573_p12 = scmp.lt.s32.totalorder %s567_s22, %s567_s22 }
  0x3b   :  { %v485_v35 = vld [vmem:[#allocation5 + $0x50] sm:$0xff]   ;;  %v488_v38 = vld [vmem:[#allocation5 + $0x68] sm:$0xff]   ;;  %v490_v40 = vld [vmem:[#allocation5 + $0x78] sm:$0xff]  }
  0x3c   :  { %v63_v17 = vrot.slane %v676_v16, %v62_v15  ;;  %v489_v39 = vld [vmem:[#allocation5 + $0x70] sm:$0xff]   ;;  %v491_v41 = vld [vmem:[#allocation5 + $0x80] sm:$0xff]   ;;  %v492_v42 = vld [vmem:[#allocation5 + $0x88] sm:$0xff]   ;;  %v152_v44 = vrot.slane %v676_v16, %v151_v43  ;;  %v273_v63 = vrot.slane %v676_v16, %v272_v62  ;;  %p574_p13 = por %p573_p12, %p572_p11 }
  0x3d   :  { %422 = vmatpush3.bf16.msra.mxu0 %v476_v2  ;;  %430 = vmatpush3.bf16.msra.mxu1 %v478_v6 }
  0x3e   :  { %447 = vmatprep.subr.bf16.mxu0 %v600_v0  ;;  %431 = vmatprep.subr.bf16.mxu1 %v600_v0  ;;  %p575_p0 = pnand %p574_p13, %p568_p10 }
  0x40   :  { %424 = vmatmul.mubr.msk.bf16.vlgmr.msra.gmra.mrb[0].mxu0 %vm76_vm1, %v54_v4 }
  0x41   :  { %463 = vmatprep.mubr.msk.bf16.mxu0 %vm601_vm0, %v600_v0  ;;  %432 = vmatpush3.bf16.msra.mxu1 %v479_v7 }
  0x42   :  { %433 = vmatprep.subr.bf16.mxu1 %v600_v0  ;;  %448 = vmatpush3.bf16.msra.mxu0 %v485_v35 }
  0x43   :  { %449 = vmatprep.subr.bf16.mxu0 %v600_v0 }
  0x45   :  { %434 = vmatpush3.bf16.msra.mxu1 %v480_v8 }
  0x46   :  { %435 = vmatprep.subr.bf16.mxu1 %v600_v0  ;;  %450 = vmatpush3.bf16.msra.mxu0 %v486_v36 }
  0x47   :  { %451 = vmatprep.subr.bf16.mxu0 %v600_v0 }
  0x49   :  { %436 = vmatpush3.bf16.msra.mxu1 %v481_v9 }
  0x4a   :  { %437 = vmatprep.subr.bf16.mxu1 %v600_v0  ;;  %452 = vmatpush3.bf16.msra.mxu0 %v487_v37 }
  0x4b   :  { %453 = vmatprep.subr.bf16.mxu0 %v600_v0 }
  0x4d   :  { %438 = vmatpush3.bf16.msra.mxu1 %v482_v10 }
  0x4e   :  { %439 = vmatprep.subr.bf16.mxu1 %v600_v0  ;;  %454 = vmatpush3.bf16.msra.mxu0 %v488_v38 }
  0x4f   :  { %455 = vmatprep.subr.bf16.mxu0 %v600_v0 }
  0x51   :  { %440 = vmatpush3.bf16.msra.mxu1 %v483_v11 }
  0x52   :  { %441 = vmatprep.subr.bf16.mxu1 %v600_v0  ;;  %456 = vmatpush3.bf16.msra.mxu0 %v489_v39 }
  0x53   :  { %457 = vmatprep.subr.bf16.mxu0 %v600_v0 }
  0x55   :  { %442 = vmatpush3.bf16.msra.mxu1 %v484_v12 }
  0x56   :  { %458 = vmatpush3.bf16.msra.mxu0 %v490_v40 }
  0x57   :  { %459 = vmatprep.subr.bf16.mxu0 %v600_v0 }
  0x5a   :  { %460 = vmatpush3.bf16.msra.mxu0 %v491_v41 }
  0x5b   :  { %461 = vmatprep.subr.bf16.mxu0 %v600_v0 }
  0x5e   :  { %462 = vmatpush3.bf16.msra.mxu0 %v492_v42 }
 0x113   :  { %v114_v18 = vpop.f32.mrb[0].mxu0 }
 0x114   :  { %v115_v19 = vadd.f32 %v114_v18, %v63_v17  ;;  %v425_v20 = vpop.f32.mrb[1].mxu0 }
 0x115   :  { %v117_v21 = vpop.f32.mrb[2].mxu0 }
 0x116   :  { %v120_v22 = vmin.f32 %v115_v19, 20.0  ;;  %v426_v23 = vpop.f32.mrb[3].mxu0  ;;  %vm130_vm2 = vcmp.gt.f32.partialorder %v115_v19, 20.0 }
 0x118   :  { %v121_v24 = vmul.f32 1.442695, %v120_v22 }
 0x11a   :  { %493 = vpow2.f32 %v121_v24 }
 0x124   :  { %v494_v25 = vpop.eup %493 }
 0x125   :  { %v123_v26 = vmul.f32 %v494_v25, %v494_v25  ;;  %v124_v27 = vmul.f32 2.0, %v494_v25 }
 0x127   :  { %v125_v28 = vadd.f32 %v124_v27, %v123_v26 }
 0x129   :  { %v127_v29 = vadd.f32 2.0, %v125_v28  ;;  %v126_v30 = vmul.f32 %v125_v28, %v115_v19 }
 0x12b   :  { %495 = vrcp.f32 %v127_v29 }
 0x135   :  { %v496_v31 = vpop.eup %495 }
 0x136   :  { %v129_v32 = vmul.f32 %v496_v31, %v126_v30 }
 0x138   :  { %v131_v33 = vsel %vm130_vm2, %v115_v19, %v129_v32 }
 0x139   :  { %v148_v34 = vpack.c.bf16 %v131_v33, %v131_v33 }
 0x13b   :  { %444 = vmatmul.mubr.bf16.vlgmr.msra.gmra.mrb[0].mxu1 %v148_v34 }
 0x20e   :  { %v235_v45 = vpop.f32.mrb[0].mxu1 }
 0x20f   :  { %v236_v46 = vadd.f32 %v235_v45, %v152_v44  ;;  %v445_v47 = vpop.f32.mrb[1].mxu1 }
 0x210   :  { %v238_v48 = vpop.f32.mrb[2].mxu1 }
 0x211   :  { %v241_v49 = vmin.f32 %v236_v46, 20.0  ;;  %v446_v50 = vpop.f32.mrb[3].mxu1  ;;  %vm251_vm3 = vcmp.gt.f32.partialorder %v236_v46, 20.0 }
 0x213   :  { %v242_v51 = vmul.f32 1.442695, %v241_v49 }
 0x215   :  { %497 = vpow2.f32 %v242_v51 }
 0x21f   :  { %v498_v52 = vpop.eup %497 }
 0x220   :  { %v244_v53 = vmul.f32 %v498_v52, %v498_v52  ;;  %v245_v54 = vmul.f32 2.0, %v498_v52 }
 0x222   :  { %v246_v55 = vadd.f32 %v245_v54, %v244_v53 }
 0x224   :  { %v248_v56 = vadd.f32 2.0, %v246_v55  ;;  %v247_v57 = vmul.f32 %v246_v55, %v236_v46 }
 0x226   :  { %499 = vrcp.f32 %v248_v56 }
 0x230   :  { %v500_v58 = vpop.eup %499 }
 0x231   :  { %v250_v59 = vmul.f32 %v500_v58, %v247_v57 }
 0x233   :  { %v252_v60 = vsel %vm251_vm3, %v236_v46, %v250_v59 }
 0x234   :  { %v269_v61 = vpack.c.bf16 %v252_v60, %v252_v60 }
 0x236   :  { %464 = vmatmul.mubr.bf16.vlgmr.msra.gmra.mrb[4].mxu0 %v269_v61 }
 0x309   :  { %v356_v0 = vpop.f32.mrb[4].mxu0 }
 0x30a   :  { %v357_v1 = vadd.f32 %v356_v0, %v273_v63  ;;  %v465_v2 = vpop.f32.mrb[5].mxu0 }
 0x30b   :  { %v359_v3 = vpop.f32.mrb[6].mxu0 }
 0x30c   :  { %362 = vst [vmem:[#allocation8] sm:$0xff] %v357_v1  ;;  %v466_v4 = vpop.f32.mrb[7].mxu0 }
 0x30d   :  { %578 = shalt.err (!%p575_p0)
}
 0x30e   :  { %s579_s25 = scalar_lea.hbm %s705_s3, 128 }
 0x30f   :  { %p580_p1 = scmp.ne.s32.totalorder %s705_s3, %s579_s25  ;;  %p583_p2 = scmp.lt.u32.totalorder %s579_s25, %s705_s3 }
 0x311   :  { %p585_p3 = pnand %p583_p2, %p580_p1 }
 0x313   :  { %588 = shalt.err (!%p585_p3)
}
 0x314   :  { %372 = dma.vmem_to_hbm [thread:$0]  %s370_s21, 128, %s705_s3, [#allocation4]  }
 0x315   :  { %593 = dma.done.wait [#allocation4], 128  }
 0x316   :  { %594 = vsyncadd [#allocation4], 4294967168 }
 0x317   :  { %376 = vsyncpa [#allocation3], 1 }
 0x318   :  { %377 = vsyncpa [#allocation6], 1 }
 0x319   :  { %378 = vsyncpa [#allocation4], 1 }

</bundles_post_ra>
